<compile_context>
chip_gen: v6e
topology: v6e:2x2x1
jax: 0.10.0
libtpu: 0.0.40
codegen_flags: <defaults>
</compile_context>

<pallas_src>
import functools

import jax
import jax.numpy as jnp
from jax.experimental import pallas as pl
from jax.experimental.pallas import tpu as pltpu


# ---------------------------------------------------------------------------
# Pass 1: per-channel stats -> folded (scale, shift)
# ---------------------------------------------------------------------------
def _stats_kernel(x_ref, w_ref, b_ref, scale_ref, shift_ref,
                  sum_ref, sq_ref, *, inv_m, eps):
    # x_ref: (C_TILE, HW_TILE); w/b/scale/shift/sum/sq refs: (C_TILE, 1)
    ni = pl.program_id(1)
    hj = pl.program_id(2)

    @pl.when((ni == 0) & (hj == 0))
    def _init():
        sum_ref[...] = jnp.zeros_like(sum_ref)
        sq_ref[...] = jnp.zeros_like(sq_ref)

    x = x_ref[...].astype(jnp.float32)
    # Reduce this block along HW immediately; only (C_TILE,1) partials live in VMEM.
    sum_ref[...] += jnp.sum(x, axis=1, keepdims=True)
    sq_ref[...] += jnp.sum(x * x, axis=1, keepdims=True)

    @pl.when((ni == pl.num_programs(1) - 1) & (hj == pl.num_programs(2) - 1))
    def _finalize():
        mean = sum_ref[...] * jnp.float32(inv_m)
        # guard against tiny negative variance from E[x^2] - mean^2 cancellation
        var = jnp.maximum(sq_ref[...] * jnp.float32(inv_m) - mean * mean,
                          jnp.float32(0.0))
        invstd = jax.lax.rsqrt(var + jnp.float32(eps))
        scale = invstd * w_ref[...]
        shift = b_ref[...] - mean * scale
        scale_ref[...] = scale
        shift_ref[...] = shift


# ---------------------------------------------------------------------------
# Pass 2: elementwise normalize  out = x * scale + shift
# ---------------------------------------------------------------------------
def _elemt_kernel(x_ref, scale_ref, shift_ref, o_ref):
    x = x_ref[...].astype(jnp.float32)                      # (C_TILE, HW_TILE)
    o_ref[...] = (x * scale_ref[...] + shift_ref[...]).astype(o_ref.dtype)


# ---------------------------------------------------------------------------
# Tile selection (exact divisors only -> no ragged-tail masking needed)
# ---------------------------------------------------------------------------
def _pick_c_tile(c):
    # Sublane rule: second-last block dim must be a multiple of 8 or equal c.
    if c % 8 != 0:
        return c
    for cand in (64, 32, 16, 8):
        if c % cand == 0:
            return cand
    return c


def _pick_hw_tile(hw, c_tile, itemsize, budget_bytes=2 * 1024 * 1024):
    # Lane rule: last block dim must be a multiple of 128 or equal hw.
    # Pick the largest exact divisor that keeps one block under budget_bytes.
    cap = max(1, budget_bytes // max(1, c_tile * itemsize))
    if hw % 128 == 0:
        units = hw // 128
        cap_units = max(1, cap // 128)
        best = 1
        for d in range(1, min(units, cap_units) + 1):
            if units % d == 0:
                best = d
        return best * 128
    return hw  # not lane-aligned: block must equal the full spatial dim


# ---------------------------------------------------------------------------
# Wrapper
# ---------------------------------------------------------------------------
def sync_batch_norm_forward(x_nchw, weight, bias, eps=1e-5):
    """x_nchw: (N, C, H, W); weight, bias: (C,). Returns (N, C, H, W)."""
    n, c, h, w = x_nchw.shape
    hw = h * w
    m = n * hw
    if m <= 1:
        raise ValueError(
            f"Expected more than 1 value per channel when training, got input size {m}")

    # Free reshape (contiguous trailing dims) -- no HBM transpose passes.
    x3 = x_nchw.reshape(n, c, hw)
    w_c1 = weight.reshape(c, 1).astype(jnp.float32)
    b_c1 = bias.reshape(c, 1).astype(jnp.float32)

    itemsize = jnp.dtype(x_nchw.dtype).itemsize
    c_tile = _pick_c_tile(c)
    hw_tile = _pick_hw_tile(hw, c_tile, itemsize)
    grid = (c // c_tile, n, hw // hw_tile)
    total = n * c * hw

    # ---- pass 1: stats -> (scale, shift) ------------------------------------
    scale, shift = pl.pallas_call(
        functools.partial(_stats_kernel, inv_m=1.0 / m, eps=eps),
        out_shape=(jax.ShapeDtypeStruct((c, 1), jnp.float32),
                   jax.ShapeDtypeStruct((c, 1), jnp.float32)),
        grid_spec=pltpu.PrefetchScalarGridSpec(
            num_scalar_prefetch=0,
            grid=grid,
            in_specs=[
                pl.BlockSpec((None, c_tile, hw_tile), lambda ci, ni, hj: (ni, ci, hj)),
                pl.BlockSpec((c_tile, 1), lambda ci, ni, hj: (ci, 0)),
                pl.BlockSpec((c_tile, 1), lambda ci, ni, hj: (ci, 0)),
            ],
            out_specs=(
                pl.BlockSpec((c_tile, 1), lambda ci, ni, hj: (ci, 0)),
                pl.BlockSpec((c_tile, 1), lambda ci, ni, hj: (ci, 0)),
            ),
            scratch_shapes=[
                pltpu.VMEM((c_tile, 1), jnp.float32),
                pltpu.VMEM((c_tile, 1), jnp.float32),
            ],
        ),
        compiler_params=pltpu.CompilerParams(
            dimension_semantics=("parallel", "arbitrary", "arbitrary"),
            vmem_limit_bytes=32 * 1024 * 1024,
        ),
        cost_estimate=pl.CostEstimate(
            flops=3 * total,
            transcendentals=c,
            bytes_accessed=total * itemsize + 4 * c * 4,
        ),
    )(x3, w_c1, b_c1)

    # ---- pass 2: elementwise normalize --------------------------------------
    out3 = pl.pallas_call(
        _elemt_kernel,
        out_shape=jax.ShapeDtypeStruct((n, c, hw), x_nchw.dtype),
        grid_spec=pltpu.PrefetchScalarGridSpec(
            num_scalar_prefetch=0,
            grid=grid,
            in_specs=[
                pl.BlockSpec((None, c_tile, hw_tile), lambda ci, ni, hj: (ni, ci, hj)),
                pl.BlockSpec((c_tile, 1), lambda ci, ni, hj: (ci, 0)),
                pl.BlockSpec((c_tile, 1), lambda ci, ni, hj: (ci, 0)),
            ],
            out_specs=pl.BlockSpec((None, c_tile, hw_tile),
                                   lambda ci, ni, hj: (ni, ci, hj)),
        ),
        compiler_params=pltpu.CompilerParams(
            dimension_semantics=("parallel", "parallel", "parallel"),
            vmem_limit_bytes=32 * 1024 * 1024,
        ),
        cost_estimate=pl.CostEstimate(
            flops=2 * total,
            transcendentals=0,
            bytes_accessed=2 * total * itemsize + 2 * c * 4,
        ),
    )(x3, scale, shift)

    # Free reshape back to NCHW.
    return out3.reshape(n, c, h, w)


# ---------------------------------------------------------------------------
# Pure-JAX reference (torch.batch_norm_stats + batch_norm_elemt, world_size==1)
# ---------------------------------------------------------------------------
def _reference_forward(x, weight, bias, eps=1e-5):
    mean = jnp.mean(x, axis=(0, 2, 3), keepdims=True)
    var = jnp.mean((x - mean) ** 2, axis=(0, 2, 3), keepdims=True)  # biased
    invstd = 1.0 / jnp.sqrt(var + eps)
    w = weight.reshape(1, -1, 1, 1)
    b = bias.reshape(1, -1, 1, 1)
    return (x - mean) * invstd * w + b


if __name__ == "__main__":
    key = jax.random.PRNGKey(0)
    N, C, H, W = 2, 4, 16, 16
    kx, kw, kb = jax.random.split(key, 3)
    x = jax.random.normal(kx, (N, C, H, W), dtype=jnp.float32)

    # Deterministic parameter init matching the module's __init__.
    weight = jnp.ones((C,), dtype=jnp.float32)   # nn.Parameter(torch.ones)
    bias = jnp.zeros((C,), dtype=jnp.float32)    # nn.Parameter(torch.zeros)
    # TODO(synk): running_mean / running_var momentum update (side effect of
    # batch_norm_gather_stats_with_counts) is buffer bookkeeping not returned by
    # the forward; omitted here.

    out = sync_batch_norm_forward(x, weight, bias, eps=1e-5)
    out = jax.block_until_ready(out)
    ref = _reference_forward(x, weight, bias, eps=1e-5)
    assert out.shape == (N, C, H, W)
    assert jnp.allclose(out, ref, atol=1e-5, rtol=1e-5)

    # Extra check with a non-trivial affine (same shapes -> no recompile) to make
    # sure the folded scale/shift path is exercised.
    w2 = jax.random.normal(kw, (C,), dtype=jnp.float32) + 1.0
    b2 = jax.random.normal(kb, (C,), dtype=jnp.float32)
    out2 = jax.block_until_ready(sync_batch_norm_forward(x, w2, b2, eps=1e-5))
    ref2 = _reference_forward(x, w2, b2, eps=1e-5)
    assert jnp.allclose(out2, ref2, atol=1e-5, rtol=1e-5)

    print("KERNEL_OK")
</pallas_src>

<mosaic_0001>
module attributes {stable_mosaic.version = 11 : i64} {
  func.func @_stats_kernel(%arg0: i32, %arg1: i32, %arg2: i32, %arg3: memref<1x4x256xf32, #tpu.memory_space<vmem>>, %arg4: memref<4x1xf32, #tpu.memory_space<vmem>>, %arg5: memref<4x1xf32, #tpu.memory_space<vmem>>, %arg6: memref<4x1xf32, #tpu.memory_space<vmem>>, %arg7: memref<4x1xf32, #tpu.memory_space<vmem>>, %arg8: memref<4x1xf32, #tpu.memory_space<vmem>>, %arg9: memref<4x1xf32, #tpu.memory_space<vmem>>) attributes {dimension_semantics = [#tpu.dimension_semantics<parallel>, #tpu.dimension_semantics<arbitrary>, #tpu.dimension_semantics<arbitrary>], iteration_bounds = array<i64: 1, 2, 1>, scalar_prefetch = 0 : i64, scratch_operands = 2 : i64, tpu.core_type = #tpu.core_type<tc>, window_params = [{transform_indices = @transform_0, window_bounds = array<i64: 1, 4, 256>}, {transform_indices = @transform_1, window_bounds = array<i64: 4, 1>}, {transform_indices = @transform_2, window_bounds = array<i64: 4, 1>}, {transform_indices = @transform_3, window_bounds = array<i64: 4, 1>}, {transform_indices = @transform_4, window_bounds = array<i64: 4, 1>}]} {
    %c0_i32 = arith.constant 0 : i32
    %0 = arith.cmpi eq, %arg1, %c0_i32 : i32
    %c0_i32_0 = arith.constant 0 : i32
    %1 = arith.cmpi eq, %arg2, %c0_i32_0 : i32
    %2 = arith.andi %0, %1 : i1
    %3 = arith.extui %2 : i1 to i32
    %c0_i32_1 = arith.constant 0 : i32
    %4 = arith.cmpi ne, %3, %c0_i32_1 : i32
    scf.if %4 {
      %cst_15 = arith.constant 0.000000e+00 : f32
      %23 = vector.broadcast %cst_15 : f32 to vector<4x1xf32>
      %c0_16 = arith.constant 0 : index
      %c0_17 = arith.constant 0 : index
      %24 = vector.load %arg8[%c0_16, %c0_17] : memref<4x1xf32, #tpu.memory_space<vmem>>, vector<4x1xf32>
      tpu.vector_store %arg8[%c0_16, %c0_17], %23 {strides = array<i32>} : memref<4x1xf32, #tpu.memory_space<vmem>>, vector<4x1xf32>,
      %cst_18 = arith.constant 0.000000e+00 : f32
      %25 = vector.broadcast %cst_18 : f32 to vector<4x1xf32>
      %c0_19 = arith.constant 0 : index
      %c0_20 = arith.constant 0 : index
      %26 = vector.load %arg9[%c0_19, %c0_20] : memref<4x1xf32, #tpu.memory_space<vmem>>, vector<4x1xf32>
      tpu.vector_store %arg9[%c0_19, %c0_20], %25 {strides = array<i32>} : memref<4x1xf32, #tpu.memory_space<vmem>>, vector<4x1xf32>,
    } else {
    }
    %c0 = arith.constant 0 : index
    %c0_2 = arith.constant 0 : index
    %c0_3 = arith.constant 0 : index
    %5 = vector.load %arg3[%c0, %c0_2, %c0_3] : memref<1x4x256xf32, #tpu.memory_space<vmem>>, vector<1x4x256xf32>
    %6 = vector.shape_cast %5 : vector<1x4x256xf32> to vector<4x256xf32>
    %c0_4 = arith.constant 0 : index
    %c0_5 = arith.constant 0 : index
    %7 = vector.load %arg8[%c0_4, %c0_5] : memref<4x1xf32, #tpu.memory_space<vmem>>, vector<4x1xf32>
    %cst = arith.constant dense<0.000000e+00> : vector<4xf32>
    %8 = vector.multi_reduction <add>, %6, %cst [1] : vector<4x256xf32> to vector<4xf32>
    %9 = vector.shape_cast %8 : vector<4xf32> to vector<4x1xf32>
    %10 = arith.addf %7, %9 : vector<4x1xf32>
    %c0_6 = arith.constant 0 : index
    %c0_7 = arith.constant 0 : index
    %11 = vector.load %arg8[%c0_6, %c0_7] : memref<4x1xf32, #tpu.memory_space<vmem>>, vector<4x1xf32>
    tpu.vector_store %arg8[%c0_6, %c0_7], %10 {strides = array<i32>} : memref<4x1xf32, #tpu.memory_space<vmem>>, vector<4x1xf32>,
    %c0_8 = arith.constant 0 : index
    %c0_9 = arith.constant 0 : index
    %12 = vector.load %arg9[%c0_8, %c0_9] : memref<4x1xf32, #tpu.memory_space<vmem>>, vector<4x1xf32>
    %13 = arith.mulf %6, %6 : vector<4x256xf32>
    %cst_10 = arith.constant dense<0.000000e+00> : vector<4xf32>
    %14 = vector.multi_reduction <add>, %13, %cst_10 [1] : vector<4x256xf32> to vector<4xf32>
    %15 = vector.shape_cast %14 : vector<4xf32> to vector<4x1xf32>
    %16 = arith.addf %12, %15 : vector<4x1xf32>
    %c0_11 = arith.constant 0 : index
    %c0_12 = arith.constant 0 : index
    %17 = vector.load %arg9[%c0_11, %c0_12] : memref<4x1xf32, #tpu.memory_space<vmem>>, vector<4x1xf32>
    tpu.vector_store %arg9[%c0_11, %c0_12], %16 {strides = array<i32>} : memref<4x1xf32, #tpu.memory_space<vmem>>, vector<4x1xf32>,
    %c1_i32 = arith.constant 1 : i32
    %18 = arith.cmpi eq, %arg1, %c1_i32 : i32
    %c0_i32_13 = arith.constant 0 : i32
    %19 = arith.cmpi eq, %arg2, %c0_i32_13 : i32
    %20 = arith.andi %18, %19 : i1
    %21 = arith.extui %20 : i1 to i32
    %c0_i32_14 = arith.constant 0 : i32
    %22 = arith.cmpi ne, %21, %c0_i32_14 : i32
    scf.if %22 {
      %c0_15 = arith.constant 0 : index
      %c0_16 = arith.constant 0 : index
      %23 = vector.load %arg8[%c0_15, %c0_16] : memref<4x1xf32, #tpu.memory_space<vmem>>, vector<4x1xf32>
      %cst_17 = arith.constant 0.001953125 : f32
      %24 = vector.broadcast %cst_17 : f32 to vector<4x1xf32>
      %25 = arith.mulf %23, %24 : vector<4x1xf32>
      %c0_18 = arith.constant 0 : index
      %c0_19 = arith.constant 0 : index
      %26 = vector.load %arg9[%c0_18, %c0_19] : memref<4x1xf32, #tpu.memory_space<vmem>>, vector<4x1xf32>
      %cst_20 = arith.constant 0.001953125 : f32
      %27 = vector.broadcast %cst_20 : f32 to vector<4x1xf32>
      %28 = arith.mulf %26, %27 : vector<4x1xf32>
      %29 = arith.mulf %25, %25 : vector<4x1xf32>
      %30 = arith.subf %28, %29 : vector<4x1xf32>
      %cst_21 = arith.constant 0.000000e+00 : f32
      %31 = vector.broadcast %cst_21 : f32 to vector<4x1xf32>
      %32 = arith.maximumf %30, %31 : vector<4x1xf32>
      %cst_22 = arith.constant 9.99999974E-6 : f32
      %33 = vector.broadcast %cst_22 : f32 to vector<4x1xf32>
      %34 = arith.addf %32, %33 : vector<4x1xf32>
      %35 = math.rsqrt %34 : vector<4x1xf32>
      %c0_23 = arith.constant 0 : index
      %c0_24 = arith.constant 0 : index
      %36 = vector.load %arg4[%c0_23, %c0_24] : memref<4x1xf32, #tpu.memory_space<vmem>>, vector<4x1xf32>
      %37 = arith.mulf %35, %36 : vector<4x1xf32>
      %c0_25 = arith.constant 0 : index
      %c0_26 = arith.constant 0 : index
      %38 = vector.load %arg5[%c0_25, %c0_26] : memref<4x1xf32, #tpu.memory_space<vmem>>, vector<4x1xf32>
      %39 = arith.mulf %25, %37 : vector<4x1xf32>
      %40 = arith.subf %38, %39 : vector<4x1xf32>
      %c0_27 = arith.constant 0 : index
      %c0_28 = arith.constant 0 : index
      %41 = vector.load %arg6[%c0_27, %c0_28] : memref<4x1xf32, #tpu.memory_space<vmem>>, vector<4x1xf32>
      tpu.vector_store %arg6[%c0_27, %c0_28], %37 {strides = array<i32>} : memref<4x1xf32, #tpu.memory_space<vmem>>, vector<4x1xf32>,
      %c0_29 = arith.constant 0 : index
      %c0_30 = arith.constant 0 : index
      %42 = vector.load %arg7[%c0_29, %c0_30] : memref<4x1xf32, #tpu.memory_space<vmem>>, vector<4x1xf32>
      tpu.vector_store %arg7[%c0_29, %c0_30], %40 {strides = array<i32>} : memref<4x1xf32, #tpu.memory_space<vmem>>, vector<4x1xf32>,
    } else {
    }
    return
  }
  func.func @transform_0(%arg0: i32, %arg1: i32, %arg2: i32) -> (i32, i32, i32) {
    %c0_i32 = arith.constant 0 : i32
    return %arg1, %arg0, %arg2 : i32, i32, i32
  }
  func.func @transform_1(%arg0: i32, %arg1: i32, %arg2: i32) -> (i32, i32) {
    %c0_i32 = arith.constant 0 : i32
    %c0_i32_0 = arith.constant 0 : i32
    return %arg0, %c0_i32 : i32, i32
  }
  func.func @transform_2(%arg0: i32, %arg1: i32, %arg2: i32) -> (i32, i32) {
    %c0_i32 = arith.constant 0 : i32
    %c0_i32_0 = arith.constant 0 : i32
    return %arg0, %c0_i32 : i32, i32
  }
  func.func @transform_3(%arg0: i32, %arg1: i32, %arg2: i32) -> (i32, i32) {
    %c0_i32 = arith.constant 0 : i32
    %c0_i32_0 = arith.constant 0 : i32
    return %arg0, %c0_i32 : i32, i32
  }
  func.func @transform_4(%arg0: i32, %arg1: i32, %arg2: i32) -> (i32, i32) {
    %c0_i32 = arith.constant 0 : i32
    %c0_i32_0 = arith.constant 0 : i32
    return %arg0, %c0_i32 : i32, i32
  }
}

</mosaic_0001>

<bundles_post_ra>
// kernel: tpu_custom_call.1
= control target key start
LH: loop header
LB: loop body
LE: loop exit
PB: predicated region body
PF: predicated region fallthrough
CT: control target
= control target key end

     0   :  { %10 = vsyncpa [#allocation5], 0  ;;  %s777_s0 = inlined_call_operand.hbm [shape: f32[2,4,256], index: 0, kind: input, shape index: {}]   ;;  %s778_s1 = inlined_call_operand.vmem [shape: f32[4,1], index: 1, kind: input, shape index: {}]   ;;  %s779_s2 = inlined_call_operand.vmem [shape: f32[4,1], index: 2, kind: input, shape index: {}]   ;;  %s780_s3 = inlined_call_operand.vmem [shape: f32[4,1], index: 3, kind: output, shape index: {0}]   ;;  %s781_s4 = inlined_call_operand.vmem [shape: f32[4,1], index: 4, kind: output, shape index: {1}]  }
   0x1   :  { %12 = vsyncpa [#allocation5 + $0x1], 0  ;;  %s664_s15 = smov 0   ;;  %s666_s16 = smov 0  }
   0x2   :  { %s668_s17 = smov 0   ;;  %s670_s18 = smov 0  }
   0x3   :  { %s672_s19 = smov 0   ;;  %s674_s20 = smov 0  }
   0x4 LB: > { %s479_s21 = sadd.s32 4294967295, %s635_s20   ;;  %s33_s22 = sadd.s32 1, %s631_s19  ;;  %s635_s20 = sphi %s674_s20, %s18_s20   ;;  %s631_s19 = sphi %s672_s19, %s789_s19   ;;  %s627_s18 = sphi %s670_s18, %s788_s18   ;;  %s623_s17 = sphi %s668_s17, %s787_s17   ;;  %s619_s16 = sphi %s666_s16, %s786_s16   ;;  %s615_s15 = sphi %s664_s15, %s785_s15  }
   0x5   : > { %p35_p0 = scmp.ge.s32.totalorder %s33_s22, 2  ;;  %s48_s23 = sadd.s32 1, %s623_s17 }
   0x6   : > { %p55_p1 = scmp.ne.s32.totalorder %s623_s17, %s619_s16  ;;  %p56_p2 = scmp.eq.s32.totalorder %s635_s20, 0 }
   0x7   : > { %s791_s22 = smov (%p35_p0, %s33_s22), 0  ;;  %p61_p4 = scmp.ne.s32.totalorder %s619_s16, %s615_s15 }
   0x8   : > { %p700_p3 = por %p56_p2, %p55_p1  ;;  %s41_s25 = ssub.s32 %s631_s19, %s791_s22 }
   0x9   : > { %p62_p5 = scmp.eq.s32.totalorder %s479_s21, 0  ;;  %p46_p6 = scmp.eq.s32.totalorder %s41_s25, 0 }
   0xa   : > { %p504_p8 = scmp.lt.s32.totalorder %s635_s20, 2  ;;  %s203_s28 = sand.u32 1, %s623_s17  }
   0xb   : > { %p707_p7 = por %p62_p5, %p61_p4  ;;  %s495_s29 = sshll.u32 %s631_s19, 7 }
   0xc   : > { %s713_s27 = scalar_select %p46_p6, %s623_s17, %s48_s23  }
   0xd   : > { %s484_s30 = sshll.u32 %s203_s28, 3  ;;  %s217_s7 = scalar_lea.hbm %s777_s0, %s495_s29 }
   0xe   : > { %s207_s8 = scalar_lea.vmem [#allocation4], %s484_s30  ;;  %p722_p9 = pnand %p504_p8, %p700_p3 }
   0xf   : > { %s219_s9 = sshll.u32 %s207_s8, 4  ;;  %p487_p10 = scmp.ge.s32.totalorder %s635_s20, 1  ;;  %s220_s9 = int_to_ptr.vmem [resolvable:$true] %s219_s9 }
  0x10   : > { %p224_p11 = scmp.lt.s32.totalorder %s635_s20, 3  ;;  %s204_s11 = scalar_lea.sflag [#allocation5], %s203_s28 }
  0x11   : > { %p559_p12 = pneg %p722_p9  ;;  %s570_s12 = scalar_lea.vmem %s220_s9, 128 }
  0x12   : > { %p571_p13 = scmp.ne.s32.totalorder %s220_s9, %s570_s12  ;;  %s637_s13 = smov [#allocation4]  }
  0x13   : > { %s575_s14 = sshll.u32 %s637_s13, 4  ;;  %s576_s14 = int_to_ptr.vmem [resolvable:$false] %s575_s14 }
  0x14   : > { %p573_p0 = pnand %p571_p13, %p559_p12  ;;  %s577_s15 = scalar_lea.vmem %s576_s14, 256 }
  0x15   : > { %p578_p2 = scmp.lt.s32.totalorder %s220_s9, %s576_s14  ;;  %p579_p3 = scmp.lt.s32.totalorder %s577_s15, %s570_s12 }
  0x16   : > { %p574_p1 = pneg %p573_p0 }
  0x17   : > { %p580_p4 = por %p579_p3, %p578_p2 }
  0x19   : > { %p581_p5 = pnand %p580_p4, %p574_p1 }
  0x1b   : > { %584 = shalt.err (!%p581_p5)
}
  0x1c   : > { %503 = dma.hbm_to_vmem [thread:$0]  (!%p722_p9), %s217_s7, 128, %s220_s9, %s204_s11  }
  0x1d   : > { %p225_p6 = pnand %p487_p10, %p224_p11 }
  0x1e   : > { %s230_s21 = sand.u32 (!%p225_p6), 1, %s619_s16  }
  0x1f   : > { %228 = sbr.rel (%p225_p6) target bundleno = 231 (0xe7), region = 32  ;;  %s488_s23 = sshll.u32 (!%p225_p6), %s230_s21, 3 }
  0x20   : > { %s231_s24 = scalar_lea.sflag (!%p225_p6), [#allocation5], %s230_s21  ;;  %s234_s25 = scalar_lea.vmem (!%p225_p6), [#allocation4], %s488_s23 }
  0x24   : > { %610 = dma.done.wait (%p707_p7), %s231_s24, 128  }
  0x25   : > { %612 = vsyncadd (%p707_p7), %s231_s24, 4294967168  ;;  %p287_p8 = scmp.eq.s32.totalorder %s627_s18, 0 }
  0x26   : > { %vm293_vm0 = vcmask (%p287_p8), 3072   ;;  %v638_v0 = vmov (%p287_p8), 0.0  }
  0x27   : > { %292 = sbr.rel (!%p287_p8) target bundleno = 44 (0x2c), region = 40  ;;  %294 = vst.msk [vmem:[#allocation2] sm:$0xf] (%p287_p8), %vm293_vm0, %v638_v0  ;;  %295 = vst.msk [vmem:[#allocation3] sm:$0xf] (%p287_p8), %vm293_vm0, %v638_v0 }
  0x2c PF: > { %v296_v1 = vld [vmem:[%s234_s25] sm:$0xff]  ;;  %vm301_vm1 = vcmask 1043456   ;;  %p322_p7 = scmp.eq.s32.totalorder %s627_s18, 1  ;;  %vm308_vm2 = vcmask 3072  }
  0x2d   : > { %v299_v2 = vcombine.high %v296_v1, %v296_v1  ;;  %v302_v3 = vsel %vm301_vm1, %v296_v1, 0.0  ;;  %v311_v4 = vmul.f32 %v296_v1, %v296_v1  ;;  %v336_v25 = vld [vmem:[%s778_s1] sm:$0xf] (%p322_p7) }
  0x2e   : > { %v297_v11 = vld [vmem:[#allocation2] sm:$0xf]  ;;  %v310_v14 = vld [vmem:[#allocation3] sm:$0xf] }
  0x2f   : > { %v303_v5 = vsel %vm301_vm1, %v299_v2, 0.0  ;;  %v313_v6 = vcombine.high %v311_v4, %v311_v4  ;;  %v315_v7 = vsel %vm301_vm1, %v311_v4, 0.0  ;;  %v338_v28 = vld [vmem:[%s779_s2] sm:$0xf] (%p322_p7) }
  0x30   : > { %v304_v8 = vadd.f32 %v303_v5, %v302_v3 }
  0x31   : > { %v316_v9 = vsel %vm301_vm1, %v313_v6, 0.0 }
  0x32   : > { %305 = vadd.xlane.f32.xlu0 %v304_v8  ;;  %v317_v10 = vadd.f32 %v316_v9, %v315_v7 }
  0x36   : > { %318 = vadd.xlane.f32.xlu0 %v317_v10 }
  0xbb   : > { %v306_v12 = vpop.xlane.xlu0 %305 }
  0xbc   : > { %v307_v13 = vadd.f32 %v306_v12, %v297_v11 }
  0xbe   : > { %309 = vst.msk [vmem:[#allocation2] sm:$0xf] %vm308_vm2, %v307_v13  ;;  %326 = sbr.rel (!%p322_p7) target bundleno = 231 (0xe7), region = 44 }
  0xbf   : > { %v319_v15 = vpop.xlane.xlu0 %318 }
  0xc0   : > { %v320_v16 = vadd.f32 %v319_v15, %v310_v14 }
  0xc2   : > { %321 = vst.msk [vmem:[#allocation3] sm:$0xf] %vm308_vm2, %v320_v16 }
  0xc5   : > { %v327_v17 = vld [vmem:[#allocation2] sm:$0xf] }
  0xc6   : > { %v328_v19 = vmul.f32 0.001953125, %v327_v17 }
  0xc8   : > { %v331_v21 = vmul.f32 %v328_v19, %v328_v19 }
  0xc9   : > { %v329_v18 = vld [vmem:[#allocation3] sm:$0xf] }
  0xca   : > { %v330_v20 = vmul.f32 0.001953125, %v329_v18 }
  0xcc   : > { %v332_v22 = vsub.f32 %v330_v20, %v331_v21 }
  0xce   : > { %v333_v23 = vmax.f32 %v332_v22, 0.0 }
  0xd0   : > { %v334_v24 = vadd.f32 1e-05, %v333_v23 }
  0xd2   : > { %555 = vrsqrt.f32 %v334_v24 }
  0xdf   : > { %v556_v26 = vpop.eup %555 }
  0xe0   : > { %v337_v27 = vmul.f32 %v556_v26, %v336_v25 }
  0xe2   : > { %341 = vst.msk [vmem:[%s780_s3] sm:$0xf] %vm308_vm2, %v337_v27  ;;  %v339_v29 = vmul.f32 %v337_v27, %v328_v19 }
  0xe4   : > { %v340_v30 = vsub.f32 %v338_v28, %v339_v29 }
  0xe6   : > { %342 = vst.msk [vmem:[%s781_s4] sm:$0xf] %vm308_vm2, %v340_v30 }
  0xe7 PF: > { %s18_s20 = sadd.s32 1, %s635_s20   ;;  %s785_s15 = smov %s619_s16 }
  0xe8   : > { %p15_p9 = scmp.ge.s32.totalorder %s18_s20, 4   ;;  %s786_s16 = smov %s623_s17 }
  0xe9   : > { %s787_s17 = smov %s713_s27  ;;  %s788_s18 = smov %s631_s19 }
  0xea   : > { %s789_s19 = smov %s791_s22  ;;  %17 = sbr.rel (!%p15_p9) target bundleno = 4 (0x4), region = 98 }
  0xef   :  { %376 = vsyncpa [#allocation5], 1 }
  0xf0   :  { %378 = vsyncpa [#allocation5 + $0x1], 1 }

</bundles_post_ra>
